<compile_context>
chip_gen: v7x
topology: tpu7x:2x2x1
jax: 0.10.0
libtpu: 0.0.40
codegen_flags: <defaults>
</compile_context>

<pallas_src>
import functools

import jax
import jax.numpy as jnp
import numpy as np
from jax.experimental import pallas as pl
from jax.experimental.pallas import tpu as pltpu

LOG_STD_MAX = 2.0
LOG_STD_MIN = -20.0
_HALF_LOG_2PI = 0.5 * float(np.log(2.0 * np.pi))
_SQUASH_EPS = 1e-6


def _round_up(x, m):
    return ((x + m - 1) // m) * m


# ----------------------------------------------------------------------------
# Kernel
# ----------------------------------------------------------------------------
def _d2rl_policy_kernel(x_ref, eps_ref, wx_ref, w1h_ref, whh_ref, bias_ref,
                        out_ref, *, H0p, H1p, NHp, A):
    x = x_ref[...]                                   # (TB, S)  f32 states
    eps = eps_ref[...]                               # (TB, A)  f32 reparam noise
    xb = x.astype(jnp.bfloat16)

    # One fused x-contraction covering layer-0 and both D2RL skip-concats:
    #   xw = x @ [W0 | W1_x | Wheads_x]   (column segments 128-lane aligned)
    xw = jnp.dot(xb, wx_ref[...], preferred_element_type=jnp.float32)   # (TB, XW)
    xw0 = xw[:, :H0p]                                # lane-aligned slices (free)
    xw1 = xw[:, H0p:H0p + H1p]
    xwh = xw[:, H0p + H1p:H0p + H1p + NHp]

    bias = bias_ref[...]                             # (8, lanes) packed biases
    b0 = bias[0:1, :H0p]
    b1 = bias[1:2, :H1p]
    bh = bias[2:3, :NHp]

    # --- D2RL MLP extractor (ReLU), skip-concats folded into matmuls ---------
    h0 = jnp.maximum(xw0 + b0, 0.0)                                       # (TB, H0p)
    h1 = (jnp.dot(h0.astype(jnp.bfloat16), w1h_ref[...],
                  preferred_element_type=jnp.float32) + xw1 + b1)
    h1 = jnp.maximum(h1, 0.0)                                             # (TB, H1p)

    # --- fused heads on latent = concat(h1, x); cols = [mean | value | logstd]
    heads = (jnp.dot(h1.astype(jnp.bfloat16), whh_ref[...],
                     preferred_element_type=jnp.float32) + xwh + bh)      # (TB, NHp)

    mean = heads[:, :A]
    values = heads[:, A:A + 1]
    log_std = jnp.clip(heads[:, A + 1:2 * A + 1], LOG_STD_MIN, LOG_STD_MAX)

    # --- SquashedDiagGaussian: sample, squash, log-prob (all f32) ------------
    std = jnp.exp(log_std)
    gaussian = mean + std * eps
    actions = jnp.tanh(gaussian)
    normal_logp = -0.5 * eps * eps - log_std - _HALF_LOG_2PI
    logp = jnp.sum(normal_logp, axis=-1, keepdims=True)                   # (TB, 1)
    logp = logp - jnp.sum(jnp.log(1.0 - actions * actions + _SQUASH_EPS),
                          axis=-1, keepdims=True)

    # Single assembled store: [actions | values | logp]
    out_ref[...] = jnp.concatenate([actions, values, logp], axis=-1)


# ----------------------------------------------------------------------------
# Wrapper
# ----------------------------------------------------------------------------
def _choose_tile_b(B, tile_b):
    if tile_b is None:
        tile_b = min(B, 1024)                 # amortize per-grid-step overhead
        if B >= 16:
            # Guarantee >= 2 grid steps so v7x can shard over both TensorCores.
            tile_b = min(tile_b, _round_up((B + 1) // 2, 8))
    tile_b = max(8, (tile_b // 8) * 8)        # multiple of 8 sublanes
    return tile_b


def d2rl_policy_forward(obs, eps, params, *, tile_b=None):
    """obs: (B, S) f32, eps: (B, A) f32 noise, params: packed (see pack_params).

    Returns (actions (B, A), values (B, 1), log_prob (B, 1)).
    """
    B, S = obs.shape
    A = eps.shape[-1]
    H0p, H1p, NHp = params["H0p"], params["H1p"], params["NHp"]
    XW = H0p + H1p + NHp

    tile_b = _choose_tile_b(B, tile_b)
    # Ragged batches: pad with zero rows instead of collapsing to one block.
    Bp = _round_up(B, tile_b)
    if Bp != B:
        obs = jnp.pad(obs, ((0, Bp - B), (0, 0)))
        eps = jnp.pad(eps, ((0, Bp - B), (0, 0)))
    grid = (Bp // tile_b,)

    kernel = functools.partial(_d2rl_policy_kernel, H0p=H0p, H1p=H1p, NHp=NHp, A=A)

    weight_bytes = int(params["wx"].size * 2 + params["w1h"].size * 2 +
                       params["whh"].size * 2 + params["bias"].size * 4)
    stream_bytes = 2 * 2 * tile_b * 4 * (S + A + (A + 2))    # double-buffered i/o tiles
    interm_bytes = 4 * tile_b * 4 * (XW + H0p + H1p + NHp)   # generous live-value est.
    vmem_limit = int(min(56 * 2 ** 20,
                         max(24 * 2 ** 20,
                             2 * (weight_bytes + stream_bytes + interm_bytes))))

    flops = 2 * Bp * (S * XW + H0p * H1p + H1p * NHp)
    bytes_accessed = int(4 * (obs.size + eps.size + Bp * (A + 2)) + weight_bytes)
    cost = pl.CostEstimate(flops=flops, transcendentals=3 * Bp * A,
                           bytes_accessed=bytes_accessed)

    # Weights / biases: whole-array resident in VMEM, single copy (no per-step
    # double-buffering), valid for all grid steps.
    resident = pl.BlockSpec(memory_space=pltpu.MemorySpace.VMEM)

    packed = pl.pallas_call(
        kernel,
        out_shape=jax.ShapeDtypeStruct((Bp, A + 2), jnp.float32),
        grid=grid,
        in_specs=[
            pl.BlockSpec((tile_b, S), lambda i: (i, 0)),   # obs tile
            pl.BlockSpec((tile_b, A), lambda i: (i, 0)),   # eps tile
            resident,                                      # wx   (S, XW)     bf16
            resident,                                      # w1h  (H0p, H1p)  bf16
            resident,                                      # whh  (H1p, NHp)  bf16
            resident,                                      # bias (8, lanes)  f32
        ],
        out_specs=pl.BlockSpec((tile_b, A + 2), lambda i: (i, 0)),
        compiler_params=pltpu.CompilerParams(
            dimension_semantics=("parallel",),
            vmem_limit_bytes=vmem_limit),
        cost_estimate=cost,
    )(obs, eps, params["wx"], params["w1h"], params["whh"], params["bias"])

    actions = packed[:B, :A]
    values = packed[:B, A:A + 1]
    log_prob = packed[:B, A + 1:A + 2]
    return actions, values, log_prob


# ----------------------------------------------------------------------------
# Parameter construction / packing
# ----------------------------------------------------------------------------
def init_raw_params(key, state_dim, hidden_dims, action_dim):
    """Deterministic synthetic per-layer parameters (PyTorch-module layout)."""
    H0, H1 = hidden_dims
    ks = jax.random.split(key, 10)

    def dense(k, fan_in, fan_out):
        scale = 1.0 / np.sqrt(fan_in)
        return jax.random.uniform(k, (fan_in, fan_out), jnp.float32, -scale, scale)

    def bias_vec(k, fan_in, fan_out):
        scale = 1.0 / np.sqrt(fan_in)
        return jax.random.uniform(k, (fan_out,), jnp.float32, -scale, scale)

    latent = H1 + state_dim
    return {
        "w0": dense(ks[0], state_dim, H0), "b0": bias_vec(ks[1], state_dim, H0),
        "w1": dense(ks[2], H0 + state_dim, H1), "b1": bias_vec(ks[3], H0 + state_dim, H1),
        "wv": dense(ks[4], latent, 1), "bv": bias_vec(ks[5], latent, 1),
        "wm": dense(ks[6], latent, action_dim), "bm": bias_vec(ks[7], latent, action_dim),
        "ws": dense(ks[8], latent, action_dim), "bs": bias_vec(ks[9], latent, action_dim),
    }


def pack_params(raw, state_dim, hidden_dims, action_dim):
    """Pack raw params into the kernel's fused / 128-lane-padded / bf16 layout."""
    H0, H1 = hidden_dims
    S, A = state_dim, action_dim
    NH = 2 * A + 1
    H0p, H1p, NHp = _round_up(H0, 128), _round_up(H1, 128), _round_up(NH, 128)
    XW = H0p + H1p + NHp

    # Heads reordered to the packed-output order: [mean | value | log_std].
    wheads = jnp.concatenate([raw["wm"], raw["wv"], raw["ws"]], axis=1)  # (H1+S, NH)
    bheads = jnp.concatenate([raw["bm"], raw["bv"], raw["bs"]], axis=0)  # (NH,)

    # Fused x-contraction weights: [W0 | W1_x | Wheads_x], 128-lane-aligned cols.
    wx = jnp.zeros((S, XW), jnp.float32)
    wx = wx.at[:, :H0].set(raw["w0"])
    wx = wx.at[:, H0p:H0p + H1].set(raw["w1"][H0:])
    wx = wx.at[:, H0p + H1p:H0p + H1p + NH].set(wheads[H1:])

    # Hidden-contraction weights, zero-padded to (128k, 128k) tiles.
    w1h = jnp.zeros((H0p, H1p), jnp.float32).at[:H0, :H1].set(raw["w1"][:H0])
    whh = jnp.zeros((H1p, NHp), jnp.float32).at[:H1, :NH].set(wheads[:H1])

    # All biases packed into a single (8, lanes) f32 tile (one row each).
    lanes = max(H0p, H1p, NHp)
    bias = jnp.zeros((8, lanes), jnp.float32)
    bias = bias.at[0, :H0].set(raw["b0"])
    bias = bias.at[1, :H1].set(raw["b1"])
    bias = bias.at[2, :NH].set(bheads)

    return {
        "wx": wx.astype(jnp.bfloat16),     # MXU operands in bf16
        "w1h": w1h.astype(jnp.bfloat16),
        "whh": whh.astype(jnp.bfloat16),
        "bias": bias,                      # bias adds stay f32
        "H0p": H0p, "H1p": H1p, "NHp": NHp,
    }


# ----------------------------------------------------------------------------
# Pure-JAX reference (mirrors the PyTorch forward) for verification
# ----------------------------------------------------------------------------
def _reference_forward(obs, eps, raw, action_dim, *, bf16_matmuls):
    A = action_dim
    if bf16_matmuls:
        def mm(a, b):
            return jnp.dot(a.astype(jnp.bfloat16), b.astype(jnp.bfloat16),
                           preferred_element_type=jnp.float32)
    else:
        def mm(a, b):
            return jnp.dot(a, b, preferred_element_type=jnp.float32)

    x = obs
    h = jax.nn.relu(mm(x, raw["w0"]) + raw["b0"])
    cat = jnp.concatenate([h, x], axis=-1)                    # D2RL skip-concat
    h = jax.nn.relu(mm(cat, raw["w1"]) + raw["b1"])
    latent = jnp.concatenate([h, x], axis=-1)
    values = mm(latent, raw["wv"]) + raw["bv"]
    mean = mm(latent, raw["wm"]) + raw["bm"]
    log_std = jnp.clip(mm(latent, raw["ws"]) + raw["bs"], LOG_STD_MIN, LOG_STD_MAX)
    std = jnp.exp(log_std)
    g = mean + std * eps
    actions = jnp.tanh(g)
    normal_logp = -0.5 * eps * eps - log_std - _HALF_LOG_2PI
    logp = jnp.sum(normal_logp, axis=-1, keepdims=True)
    logp = logp - jnp.sum(jnp.log(1.0 - actions ** 2 + _SQUASH_EPS),
                          axis=-1, keepdims=True)
    return actions, values, logp


if __name__ == "__main__":
    # Small, module-consistent shapes: batch=8, state_dim=16, net_arch=[32,32],
    # action_dim=4 (Flatten feature extractor => features_dim == state_dim).
    B, S, A = 8, 16, 4
    net_arch = [32, 32]

    key = jax.random.PRNGKey(0)
    k_obs, k_eps, k_par = jax.random.split(key, 3)
    obs = jax.random.normal(k_obs, (B, S), jnp.float32)
    # TODO(synk): eps could be generated in-kernel (pltpu.prng_seed +
    # pltpu.prng_random_bits / stateful_normal) to drop this (B, A) input
    # stream; kept host-side for deterministic parity with the reference.
    eps = jax.random.normal(k_eps, (B, A), jnp.float32)

    raw = init_raw_params(k_par, S, net_arch, A)
    params = pack_params(raw, S, net_arch, A)

    actions, values, log_prob = jax.block_until_ready(
        d2rl_policy_forward(obs, eps, params))

    assert actions.shape == (B, A) and values.shape == (B, 1) and log_prob.shape == (B, 1)

    # Tight check vs. the same mixed-precision computation (bf16 MXU operands).
    ra, rv, rlp = _reference_forward(obs, eps, raw, A, bf16_matmuls=True)
    assert np.allclose(np.asarray(actions), np.asarray(ra), atol=2e-3)
    assert np.allclose(np.asarray(values), np.asarray(rv), atol=2e-3)
    assert np.allclose(np.asarray(log_prob), np.asarray(rlp), atol=5e-3)

    # Looser check vs. the full-f32 module semantics (bf16-operand rounding).
    fa, fv, flp = _reference_forward(obs, eps, raw, A, bf16_matmuls=False)
    assert np.allclose(np.asarray(actions), np.asarray(fa), atol=5e-2)
    assert np.allclose(np.asarray(values), np.asarray(fv), atol=5e-2)
    assert np.allclose(np.asarray(log_prob), np.asarray(flp), atol=2e-1)

    print("KERNEL_OK")
</pallas_src>

<mosaic_0001>
module attributes {stable_mosaic.version = 11 : i64} {
  func.func @_d2rl_policy_kernel(%arg0: i32, %arg1: memref<8x16xf32, #tpu.memory_space<vmem>>, %arg2: memref<8x4xf32, #tpu.memory_space<vmem>>, %arg3: memref<16x384xbf16, #tpu.memory_space<vmem>>, %arg4: memref<128x128xbf16, #tpu.memory_space<vmem>>, %arg5: memref<128x128xbf16, #tpu.memory_space<vmem>>, %arg6: memref<8x128xf32, #tpu.memory_space<vmem>>, %arg7: memref<8x6xf32, #tpu.memory_space<vmem>>) attributes {dimension_semantics = [#tpu.dimension_semantics<parallel>], iteration_bounds = array<i64: 1>, scalar_prefetch = 0 : i64, scratch_operands = 0 : i64, tpu.core_type = #tpu.core_type<tc>, window_params = [{transform_indices = @transform_0, window_bounds = array<i64: 8, 16>}, {transform_indices = @transform_1, window_bounds = array<i64: 8, 4>}, {pipeline_mode = #tpu.pipeline_mode<synchronous>, transform_indices = @transform_2, window_bounds = array<i64: 16, 384>}, {pipeline_mode = #tpu.pipeline_mode<synchronous>, transform_indices = @transform_3, window_bounds = array<i64: 128, 128>}, {pipeline_mode = #tpu.pipeline_mode<synchronous>, transform_indices = @transform_4, window_bounds = array<i64: 128, 128>}, {pipeline_mode = #tpu.pipeline_mode<synchronous>, transform_indices = @transform_5, window_bounds = array<i64: 8, 128>}, {transform_indices = @transform_6, window_bounds = array<i64: 8, 6>}]} {
    %c0 = arith.constant 0 : index
    %c0_0 = arith.constant 0 : index
    %0 = vector.load %arg1[%c0, %c0_0] : memref<8x16xf32, #tpu.memory_space<vmem>>, vector<8x16xf32>
    %c0_1 = arith.constant 0 : index
    %c0_2 = arith.constant 0 : index
    %1 = vector.load %arg2[%c0_1, %c0_2] : memref<8x4xf32, #tpu.memory_space<vmem>>, vector<8x4xf32>
    %2 = arith.truncf %0 : vector<8x16xf32> to vector<8x16xbf16>
    %c0_3 = arith.constant 0 : index
    %c0_4 = arith.constant 0 : index
    %3 = vector.load %arg3[%c0_3, %c0_4] : memref<16x384xbf16, #tpu.memory_space<vmem>>, vector<16x384xbf16>
    %cst = arith.constant dense<0.000000e+00> : vector<8x384xf32>
    %4 = tpu.matmul %2, %3, %cst {dimension_numbers = #tpu.dot_dimension_numbers<[1], [0], [0], [1], [0, 0, 1, 1], [], []>} : vector<8x16xbf16>, vector<16x384xbf16>, vector<8x384xf32> -> vector<8x384xf32>
    %5 = vector.extract_strided_slice %4 {offsets = [0, 0], sizes = [8, 128], strides = [1, 1]} : vector<8x384xf32> to vector<8x128xf32>
    %6 = vector.extract_strided_slice %4 {offsets = [0, 128], sizes = [8, 128], strides = [1, 1]} : vector<8x384xf32> to vector<8x128xf32>
    %7 = vector.extract_strided_slice %4 {offsets = [0, 256], sizes = [8, 128], strides = [1, 1]} : vector<8x384xf32> to vector<8x128xf32>
    %c0_5 = arith.constant 0 : index
    %c0_6 = arith.constant 0 : index
    %8 = vector.load %arg6[%c0_5, %c0_6] : memref<8x128xf32, #tpu.memory_space<vmem>>, vector<8x128xf32>
    %9 = vector.extract_strided_slice %8 {offsets = [0, 0], sizes = [1, 128], strides = [1, 1]} : vector<8x128xf32> to vector<1x128xf32>
    %10 = vector.extract_strided_slice %8 {offsets = [1, 0], sizes = [1, 128], strides = [1, 1]} : vector<8x128xf32> to vector<1x128xf32>
    %11 = vector.extract_strided_slice %8 {offsets = [2, 0], sizes = [1, 128], strides = [1, 1]} : vector<8x128xf32> to vector<1x128xf32>
    %12 = vector.broadcast %9 : vector<1x128xf32> to vector<8x128xf32>
    %13 = arith.addf %5, %12 : vector<8x128xf32>
    %cst_7 = arith.constant 0.000000e+00 : f32
    %14 = vector.broadcast %cst_7 : f32 to vector<8x128xf32>
    %15 = arith.maximumf %13, %14 : vector<8x128xf32>
    %16 = arith.truncf %15 : vector<8x128xf32> to vector<8x128xbf16>
    %c0_8 = arith.constant 0 : index
    %c0_9 = arith.constant 0 : index
    %17 = vector.load %arg4[%c0_8, %c0_9] : memref<128x128xbf16, #tpu.memory_space<vmem>>, vector<128x128xbf16>
    %cst_10 = arith.constant dense<0.000000e+00> : vector<8x128xf32>
    %18 = tpu.matmul %16, %17, %cst_10 {dimension_numbers = #tpu.dot_dimension_numbers<[1], [0], [0], [1], [0, 0, 1, 1], [], []>} : vector<8x128xbf16>, vector<128x128xbf16>, vector<8x128xf32> -> vector<8x128xf32>
    %19 = arith.addf %18, %6 : vector<8x128xf32>
    %20 = vector.broadcast %10 : vector<1x128xf32> to vector<8x128xf32>
    %21 = arith.addf %19, %20 : vector<8x128xf32>
    %cst_11 = arith.constant 0.000000e+00 : f32
    %22 = vector.broadcast %cst_11 : f32 to vector<8x128xf32>
    %23 = arith.maximumf %21, %22 : vector<8x128xf32>
    %24 = arith.truncf %23 : vector<8x128xf32> to vector<8x128xbf16>
    %c0_12 = arith.constant 0 : index
    %c0_13 = arith.constant 0 : index
    %25 = vector.load %arg5[%c0_12, %c0_13] : memref<128x128xbf16, #tpu.memory_space<vmem>>, vector<128x128xbf16>
    %cst_14 = arith.constant dense<0.000000e+00> : vector<8x128xf32>
    %26 = tpu.matmul %24, %25, %cst_14 {dimension_numbers = #tpu.dot_dimension_numbers<[1], [0], [0], [1], [0, 0, 1, 1], [], []>} : vector<8x128xbf16>, vector<128x128xbf16>, vector<8x128xf32> -> vector<8x128xf32>
    %27 = arith.addf %26, %7 : vector<8x128xf32>
    %28 = vector.broadcast %11 : vector<1x128xf32> to vector<8x128xf32>
    %29 = arith.addf %27, %28 : vector<8x128xf32>
    %30 = vector.extract_strided_slice %29 {offsets = [0, 0], sizes = [8, 4], strides = [1, 1]} : vector<8x128xf32> to vector<8x4xf32>
    %31 = vector.extract_strided_slice %29 {offsets = [0, 4], sizes = [8, 1], strides = [1, 1]} : vector<8x128xf32> to vector<8x1xf32>
    %32 = vector.extract_strided_slice %29 {offsets = [0, 5], sizes = [8, 4], strides = [1, 1]} : vector<8x128xf32> to vector<8x4xf32>
    %cst_15 = arith.constant -2.000000e+01 : f32
    %cst_16 = arith.constant 2.000000e+00 : f32
    %33 = vector.broadcast %cst_15 : f32 to vector<8x4xf32>
    %34 = arith.maximumf %33, %32 : vector<8x4xf32>
    %35 = vector.broadcast %cst_16 : f32 to vector<8x4xf32>
    %36 = arith.minimumf %35, %34 : vector<8x4xf32>
    %37 = math.exp %36 : vector<8x4xf32>
    %38 = arith.mulf %37, %1 : vector<8x4xf32>
    %39 = arith.addf %30, %38 : vector<8x4xf32>
    %40 = math.tanh %39 : vector<8x4xf32>
    %cst_17 = arith.constant -5.000000e-01 : f32
    %41 = vector.broadcast %cst_17 : f32 to vector<8x4xf32>
    %42 = arith.mulf %41, %1 : vector<8x4xf32>
    %43 = arith.mulf %42, %1 : vector<8x4xf32>
    %44 = arith.subf %43, %36 : vector<8x4xf32>
    %cst_18 = arith.constant 0.918938517 : f32
    %45 = vector.broadcast %cst_18 : f32 to vector<8x4xf32>
    %46 = arith.subf %44, %45 : vector<8x4xf32>
    %cst_19 = arith.constant dense<0.000000e+00> : vector<8xf32>
    %47 = vector.multi_reduction <add>, %46, %cst_19 [1] : vector<8x4xf32> to vector<8xf32>
    %48 = vector.shape_cast %47 : vector<8xf32> to vector<8x1xf32>
    %49 = arith.mulf %40, %40 : vector<8x4xf32>
    %cst_20 = arith.constant 1.000000e+00 : f32
    %50 = vector.broadcast %cst_20 : f32 to vector<8x4xf32>
    %51 = arith.subf %50, %49 : vector<8x4xf32>
    %cst_21 = arith.constant 9.99999997E-7 : f32
    %52 = vector.broadcast %cst_21 : f32 to vector<8x4xf32>
    %53 = arith.addf %51, %52 : vector<8x4xf32>
    %54 = math.log %53 : vector<8x4xf32>
    %cst_22 = arith.constant dense<0.000000e+00> : vector<8xf32>
    %55 = vector.multi_reduction <add>, %54, %cst_22 [1] : vector<8x4xf32> to vector<8xf32>
    %56 = vector.shape_cast %55 : vector<8xf32> to vector<8x1xf32>
    %57 = arith.subf %48, %56 : vector<8x1xf32>
    %58 = tpu.concatenate %40, %31, %57 in 1 : vector<8x4xf32>, vector<8x1xf32>, vector<8x1xf32> -> vector<8x6xf32>
    %c0_23 = arith.constant 0 : index
    %c0_24 = arith.constant 0 : index
    %59 = vector.load %arg7[%c0_23, %c0_24] : memref<8x6xf32, #tpu.memory_space<vmem>>, vector<8x6xf32>
    tpu.vector_store %arg7[%c0_23, %c0_24], %58 {strides = array<i32>} : memref<8x6xf32, #tpu.memory_space<vmem>>, vector<8x6xf32>,
    return
  }
  func.func @transform_0(%arg0: i32) -> (i32, i32) {
    %c0_i32 = arith.constant 0 : i32
    %c0_i32_0 = arith.constant 0 : i32
    return %arg0, %c0_i32 : i32, i32
  }
  func.func @transform_1(%arg0: i32) -> (i32, i32) {
    %c0_i32 = arith.constant 0 : i32
    %c0_i32_0 = arith.constant 0 : i32
    return %arg0, %c0_i32 : i32, i32
  }
  func.func @transform_2(%arg0: i32) -> (i32, i32) {
    %c0_i32 = arith.constant 0 : i32
    %c0_i32_0 = arith.constant 0 : i32
    %c0_i32_1 = arith.constant 0 : i32
    return %c0_i32, %c0_i32_0 : i32, i32
  }
  func.func @transform_3(%arg0: i32) -> (i32, i32) {
    %c0_i32 = arith.constant 0 : i32
    %c0_i32_0 = arith.constant 0 : i32
    %c0_i32_1 = arith.constant 0 : i32
    return %c0_i32, %c0_i32_0 : i32, i32
  }
  func.func @transform_4(%arg0: i32) -> (i32, i32) {
    %c0_i32 = arith.constant 0 : i32
    %c0_i32_0 = arith.constant 0 : i32
    %c0_i32_1 = arith.constant 0 : i32
    return %c0_i32, %c0_i32_0 : i32, i32
  }
  func.func @transform_5(%arg0: i32) -> (i32, i32) {
    %c0_i32 = arith.constant 0 : i32
    %c0_i32_0 = arith.constant 0 : i32
    %c0_i32_1 = arith.constant 0 : i32
    return %c0_i32, %c0_i32_0 : i32, i32
  }
  func.func @transform_6(%arg0: i32) -> (i32, i32) {
    %c0_i32 = arith.constant 0 : i32
    %c0_i32_0 = arith.constant 0 : i32
    return %arg0, %c0_i32 : i32, i32
  }
}

</mosaic_0001>

<bundles_post_ra>
// kernel: tpu_custom_call.1
= control target key start
LH: loop header
LB: loop body
LE: loop exit
PB: predicated region body
PF: predicated region fallthrough
CT: control target
= control target key end

     0   :  { %11 = vsyncpa [#allocation3], 0  ;;  %s813_s0 = inlined_call_operand.vmem [shape: f32[8,16], index: 0, kind: input, shape index: {}]   ;;  %s814_s1 = inlined_call_operand.vmem [shape: f32[8,4], index: 1, kind: input, shape index: {}]   ;;  %s815_s2 = inlined_call_operand.hbm [shape: bf16[16,384], index: 2, kind: input, shape index: {}]   ;;  %s816_s3 = inlined_call_operand.hbm [shape: bf16[128,128], index: 3, kind: input, shape index: {}]   ;;  %s817_s4 = inlined_call_operand.hbm [shape: bf16[128,128], index: 4, kind: input, shape index: {}]   ;;  %s818_s5 = inlined_call_operand.vmem [shape: f32[8,128], index: 5, kind: input, shape index: {}]   ;;  %s819_s6 = inlined_call_operand.hbm [shape: f32[8,6], index: 6, kind: output, shape index: {}]  }
   0x1   :  { %12 = vsyncpa [#allocation6], 0 }
   0x2   :  { %13 = vsyncpa [#allocation4], 0  ;;  %s680_s21 = smov [#allocation5]   ;;  %s586_s25 = scalar_lea.hbm %s816_s3, 1024 }
   0x3   :  { %s35_s22 = sshll.u32 %s680_s21, 4  ;;  %p587_p0 = scmp.ne.s32.totalorder %s816_s3, %s586_s25  ;;  %s36_s22 = int_to_ptr.vmem [resolvable:$true] %s35_s22 }
   0x4   :  { %p590_p1 = scmp.lt.u32.totalorder %s586_s25, %s816_s3 }
   0x6   :  { %p592_p2 = pnand %p590_p1, %p587_p0 }
   0x8   :  { %595 = shalt.err (!%p592_p2)
}
   0x9   :  { %s596_s30 = scalar_lea.vmem %s36_s22, 1024  ;;  %p601_p4 = scmp.lt.s32.totalorder %s36_s22, %s36_s22 }
   0xa   :  { %p597_p3 = scmp.ne.s32.totalorder %s36_s22, %s596_s30  ;;  %p602_p5 = scmp.lt.s32.totalorder %s596_s30, %s596_s30 }
   0xc   :  { %p603_p6 = por %p602_p5, %p601_p4 }
   0xe   :  { %p604_p7 = pnand %p603_p6, %p597_p3 }
  0x10   :  { %607 = shalt.err (!%p604_p7)
}
  0x11   :  { %s681_s7 = smov 64   ;;  %s682_s8 = smov 4  }
  0x12   :  { %41 = dma.hbm_to_vmem [thread:$0]  %s816_s3, 1024, %s36_s22, [#allocation6], %s681_s7, %s681_s7, %s682_s8  }
  0x13   :  { %s683_s11 = smov [#allocation2]   ;;  %s608_s15 = scalar_lea.hbm %s815_s2, 384 }
  0x14   :  { %s23_s12 = sshll.u32 %s683_s11, 4  ;;  %p609_p8 = scmp.ne.s32.totalorder %s815_s2, %s608_s15  ;;  %s24_s12 = int_to_ptr.vmem [resolvable:$true] %s23_s12 }
  0x15   :  { %p612_p9 = scmp.lt.u32.totalorder %s608_s15, %s815_s2 }
  0x17   :  { %p614_p10 = pnand %p612_p9, %p609_p8 }
  0x19   :  { %617 = shalt.err (!%p614_p10)
}
  0x1a   :  { %s618_s20 = scalar_lea.vmem %s24_s12, 384  ;;  %p623_p12 = scmp.lt.s32.totalorder %s24_s12, %s24_s12 }
  0x1b   :  { %p619_p11 = scmp.ne.s32.totalorder %s24_s12, %s618_s20  ;;  %p624_p13 = scmp.lt.s32.totalorder %s618_s20, %s618_s20 }
  0x1d   :  { %p625_p0 = por %p624_p13, %p623_p12 }
  0x1f   :  { %p626_p1 = pnand %p625_p0, %p619_p11 }
  0x21   :  { %629 = shalt.err (!%p626_p1)
}
  0x22   :  { %s684_s3 = smov 192   ;;  %s685_s21 = smov 12  }
  0x23   :  { %29 = dma.hbm_to_vmem [thread:$0]  %s815_s2, 384, %s24_s12, [#allocation3], %s684_s3, %s684_s3, %s685_s21  }
  0x24   :  { %s686_s24 = smov [#allocation7]   ;;  %s630_s28 = scalar_lea.hbm %s817_s4, 1024 }
  0x25   :  { %s47_s25 = sshll.u32 %s686_s24, 4  ;;  %p631_p2 = scmp.ne.s32.totalorder %s817_s4, %s630_s28  ;;  %s48_s25 = int_to_ptr.vmem [resolvable:$true] %s47_s25 }
  0x26   :  { %p634_p3 = scmp.lt.u32.totalorder %s630_s28, %s817_s4 }
  0x28   :  { %p636_p4 = pnand %p634_p3, %p631_p2 }
  0x2a   :  { %639 = shalt.err (!%p636_p4)
}
  0x2b   :  { %s640_s11 = scalar_lea.vmem %s48_s25, 1024  ;;  %p645_p6 = scmp.lt.s32.totalorder %s48_s25, %s48_s25 }
  0x2c   :  { %p641_p5 = scmp.ne.s32.totalorder %s48_s25, %s640_s11  ;;  %p646_p7 = scmp.lt.s32.totalorder %s640_s11, %s640_s11 }
  0x2e   :  { %p647_p8 = por %p646_p7, %p645_p6 }
  0x30   :  { %p648_p9 = pnand %p647_p8, %p641_p5 }
  0x32   :  { %651 = shalt.err (!%p648_p9)
}
  0x33   :  { %53 = dma.hbm_to_vmem [thread:$0]  %s817_s4, 1024, %s48_s25, [#allocation6], %s681_s7, %s681_s7, %s682_s8  }
  0x34   :  { %674 = dma.done.wait [#allocation3], 384  }
  0x35   :  { %675 = vsyncadd [#allocation3], 4294966912 }
  0x36   :  { %676 = dma.done.wait [#allocation6], 2048  }
  0x37   :  { %677 = vsyncadd [#allocation6], 4294965248  ;;  %v687_v0 = vmov 0   ;;  %v688_v1 = vmov 0.0   ;;  %v560_v2 = vld [vmem:[#allocation2 + $0x4] ss:$12 sps:$4 sm:$0xff]   ;;  %v175_v21 = vlaneseq }
  0x38   :  { %125 = vmatprep.mubr.bf16.mxu0 %v687_v0  ;;  %501 = vmatprep.subr.bf16.mxu1 %v688_v1  ;;  %v562_v3 = vld [vmem:[#allocation2] ss:$12 sps:$4 sm:$0xff]   ;;  %vm89_vm0 = vcmask 130048   ;;  %v563_v6 = vld [vmem:[#allocation5] sm:$0xff]   ;;  %v566_v9 = vld [vmem:[#allocation5 + $0x18] sm:$0xff]   ;;  %vm689_vm1 = vmmov 0  }
  0x39   :  { %v66_v4 = vld [vmem:[%s813_s0] sm:$0xff]  ;;  %93 = vmatprep.subr.bf16.mxu0 %v560_v2  ;;  %v565_v8 = vld [vmem:[#allocation5 + $0x10] sm:$0xff]   ;;  %v567_v10 = vld [vmem:[#allocation5 + $0x20] sm:$0xff]   ;;  %503 = vmatprep.mubr.msk.bf16.mxu1 %vm689_vm1, %v688_v1  ;;  %v176_v22 = vshrl.u32 %v175_v21, 7  ;;  %vm425_vm2 = vcmask 31744   ;;  %s692_s15 = smov [#allocation8]  }
  0x3a   :  { %v68_v5 = vpack.c.bf16 %v66_v4, %v66_v4  ;;  %94 = vmatpush1.bf16.msra.mxu0 %v562_v3  ;;  %v564_v7 = vld [vmem:[#allocation5 + $0x8] sm:$0xff]   ;;  %v569_v12 = vld [vmem:[#allocation5 + $0x30] sm:$0xff]   ;;  %v570_v13 = vld [vmem:[#allocation5 + $0x38] sm:$0xff]   ;;  %s449_s16 = sshll.u32 %s692_s15, 4  ;;  %vm439_vm3 = vcmask 39936   ;;  %vm441_vm4 = vcmask 48128   ;;  %s450_s16 = int_to_ptr.vmem [resolvable:$true] %s449_s16 }
  0x3b   :  { %507 = vmatprep.subr.bf16.mxu0 %v688_v1  ;;  %v568_v11 = vld [vmem:[#allocation5 + $0x28] sm:$0xff]   ;;  %v571_v14 = vld [vmem:[#allocation2 + $0x8] ss:$12 sps:$4 sm:$0xff]   ;;  %v572_v15 = vld [vmem:[#allocation7] sm:$0xff]   ;;  %v177_v23 = vsub.s32 0, %v176_v22  ;;  %v288_v40 = vsub.s32 1, %v176_v22  ;;  %p657_p11 = scmp.lt.s32.totalorder %s450_s16, %s450_s16 }
  0x3c   :  { %502 = vmatpush3.bf16.msra.mxu1 %v571_v14  ;;  %v573_v16 = vld [vmem:[#allocation7 + $0x8] sm:$0xff]   ;;  %v574_v17 = vld [vmem:[#allocation7 + $0x10] sm:$0xff]   ;;  %v575_v18 = vld [vmem:[#allocation7 + $0x18] sm:$0xff]   ;;  %v399_v50 = vsub.s32 2, %v176_v22  ;;  %s652_s17 = scalar_lea.vmem %s450_s16, 128 }
  0x3d   :  { %462 = vmatmul.mubr.msk.bf16.vlgmr.msra.gmra.mrb[0].mxu0 %vm89_vm0, %v68_v5  ;;  %527 = vmatprep.subr.bf16.mxu1 %v688_v1  ;;  %v576_v19 = vld [vmem:[#allocation7 + $0x20] sm:$0xff]   ;;  %v577_v20 = vld [vmem:[#allocation7 + $0x28] sm:$0xff]   ;;  %v578_v33 = vld [vmem:[#allocation7 + $0x30] sm:$0xff]   ;;  %p653_p10 = scmp.ne.s32.totalorder %s450_s16, %s652_s17  ;;  %p658_p12 = scmp.lt.s32.totalorder %s652_s17, %s652_s17 }
  0x3e   :  { %508 = vmatpush3.bf16.msra.mxu0 %v563_v6  ;;  %523 = vmatprep.mubr.msk.bf16.mxu0 %vm689_vm1, %v688_v1  ;;  %v174_v24 = vld [vmem:[%s818_s5] sm:$0xff]  ;;  %v579_v34 = vld [vmem:[#allocation7 + $0x38] sm:$0xff]   ;;  %s690_s5 = smov 5  }
  0x3f   :  { %509 = vmatprep.subr.bf16.mxu0 %v688_v1  ;;  %504 = vmatmul.mubr.msk.bf16.vlgmr.msra.gmra.mrb[0].mxu1 %vm89_vm0, %v68_v5  ;;  %v178_v25 = vrot.slane %v174_v24, %v177_v23  ;;  %v67_v35 = vld [vmem:[%s814_s1] sm:$0xff]  ;;  %v289_v41 = vrot.slane %v174_v24, %v288_v40  ;;  %v400_v51 = vrot.slane %v174_v24, %v399_v50  ;;  %s691_s1 = smov 123   ;;  %p659_p13 = por %p658_p12, %p657_p11 }
  0x40   :  { %528 = vmatpush3.bf16.msra.mxu1 %v572_v15  ;;  %543 = vmatprep.mubr.msk.bf16.mxu1 %vm689_vm1, %v688_v1  ;;  %v417_v0 = vmul.f32 -0.5, %v67_v35 }
  0x41   :  { %529 = vmatprep.subr.bf16.mxu1 %v688_v1  ;;  %407 = vrot.lane.b32.xlu0 %v67_v35, %s690_s5  ;;  %p660_p0 = pnand %p659_p13, %p653_p10 }
  0x42   :  { %510 = vmatpush3.bf16.msra.mxu0 %v564_v7 }
  0x43   :  { %511 = vmatprep.subr.bf16.mxu0 %v688_v1 }
  0x44   :  { %530 = vmatpush3.bf16.msra.mxu1 %v573_v16 }
  0x45   :  { %531 = vmatprep.subr.bf16.mxu1 %v688_v1 }
  0x46   :  { %512 = vmatpush3.bf16.msra.mxu0 %v565_v8 }
  0x47   :  { %513 = vmatprep.subr.bf16.mxu0 %v688_v1 }
  0x48   :  { %532 = vmatpush3.bf16.msra.mxu1 %v574_v17 }
  0x49   :  { %533 = vmatprep.subr.bf16.mxu1 %v688_v1 }
  0x4a   :  { %514 = vmatpush3.bf16.msra.mxu0 %v566_v9 }
  0x4b   :  { %515 = vmatprep.subr.bf16.mxu0 %v688_v1 }
  0x4c   :  { %534 = vmatpush3.bf16.msra.mxu1 %v575_v18 }
  0x4d   :  { %535 = vmatprep.subr.bf16.mxu1 %v688_v1 }
  0x4e   :  { %516 = vmatpush3.bf16.msra.mxu0 %v567_v10 }
  0x4f   :  { %517 = vmatprep.subr.bf16.mxu0 %v688_v1 }
  0x50   :  { %536 = vmatpush3.bf16.msra.mxu1 %v576_v19 }
  0x51   :  { %537 = vmatprep.subr.bf16.mxu1 %v688_v1 }
  0x52   :  { %518 = vmatpush3.bf16.msra.mxu0 %v568_v11 }
  0x53   :  { %519 = vmatprep.subr.bf16.mxu0 %v688_v1 }
  0x54   :  { %538 = vmatpush3.bf16.msra.mxu1 %v577_v20 }
  0x55   :  { %539 = vmatprep.subr.bf16.mxu1 %v688_v1 }
  0x56   :  { %520 = vmatpush3.bf16.msra.mxu0 %v569_v12 }
  0x57   :  { %521 = vmatprep.subr.bf16.mxu0 %v688_v1 }
  0x58   :  { %540 = vmatpush3.bf16.msra.mxu1 %v578_v33 }
  0x59   :  { %541 = vmatprep.subr.bf16.mxu1 %v688_v1  ;;  %v418_v1 = vmul.f32 %v417_v0, %v67_v35 }
  0x5a   :  { %522 = vmatpush3.bf16.msra.mxu0 %v570_v13 }
  0x5c   :  { %542 = vmatpush3.bf16.msra.mxu1 %v579_v34 }
  0xb3   :  { %v408_v61 = vpop.permute.xlu0 %407 }
 0x110   :  { %v127_v26 = vpop.f32.mrb[0].mxu0 }
 0x111   :  { %v179_v27 = vadd.f32 %v178_v25, %v127_v26  ;;  %v129_v28 = vpop.f32.mrb[1].mxu0 }
 0x112   :  { %v131_v29 = vpop.f32.mrb[2].mxu0  ;;  %v168_v36 = vpop.f32.mrb[0].mxu1 }
 0x113   :  { %v180_v30 = vmax.f32 %v179_v27, 0.0  ;;  %v132_v31 = vpop.f32.mrb[3].mxu0  ;;  %v505_v37 = vpop.f32.mrb[1].mxu1 }
 0x114   :  { %v171_v38 = vpop.f32.mrb[2].mxu1 }
 0x115   :  { %v181_v32 = vpack.c.bf16 %v180_v30, %v180_v30  ;;  %v506_v39 = vpop.f32.mrb[3].mxu1 }
 0x117   :  { %524 = vmatmul.mubr.bf16.vlgmr.msra.gmra.mrb[4].mxu0 %v181_v32 }
 0x1ea   :  { %v280_v42 = vpop.f32.mrb[4].mxu0 }
 0x1eb   :  { %v281_v43 = vadd.f32 %v280_v42, %v129_v28  ;;  %v525_v44 = vpop.f32.mrb[5].mxu0 }
 0x1ec   :  { %v283_v45 = vpop.f32.mrb[6].mxu0 }
 0x1ed   :  { %v290_v46 = vadd.f32 %v289_v41, %v281_v43  ;;  %v526_v47 = vpop.f32.mrb[7].mxu0 }
 0x1ef   :  { %v291_v48 = vmax.f32 %v290_v46, 0.0 }
 0x1f1   :  { %v292_v49 = vpack.c.bf16 %v291_v48, %v291_v48 }
 0x1f3   :  { %544 = vmatmul.mubr.bf16.vlgmr.msra.gmra.mrb[4].mxu1 %v292_v49 }
 0x2c6   :  { %v391_v52 = vpop.f32.mrb[4].mxu1 }
 0x2c7   :  { %v392_v53 = vadd.f32 %v391_v52, %v168_v36  ;;  %v545_v54 = vpop.f32.mrb[5].mxu1 }
 0x2c8   :  { %v394_v55 = vpop.f32.mrb[6].mxu1 }
 0x2c9   :  { %v401_v56 = vadd.f32 %v400_v51, %v392_v53  ;;  %v546_v57 = vpop.f32.mrb[7].mxu1 }
 0x2cb   :  { %v402_v58 = vmax.f32 %v401_v56, -20.0 }
 0x2cd   :  { %v403_v59 = vmin.f32 %v402_v58, 2.0 }
 0x2cf   :  { %420 = vrot.lane.b32.xlu1 %v403_v59, %s691_s1  ;;  %v404_v60 = vmul.f32 1.442695, %v403_v59 }
 0x2d1   :  { %580 = vpow2.f32 %v404_v60 }
 0x2db   :  { %v581_v62 = vpop.eup %580 }
 0x2dc   :  { %v410_v63 = vmul.f32 %v581_v62, %v408_v61 }
 0x2de   :  { %412 = vrot.lane.b32.xlu0 %v410_v63, %s691_s1 }
 0x341   :  { %v421_v2 = vpop.permute.xlu1 %420 }
 0x342   :  { %v423_v3 = vsub.f32 %v418_v1, %v421_v2 }
 0x344   :  { %v480_v4 = vadd.f32 -0.9189385, %v423_v3 }
 0x346   :  { %v426_v5 = vsel %vm425_vm2, %v480_v4, 0.0 }
 0x347   :  { %427 = vadd.xlane.f32.xlu1 %v426_v5 }
 0x350   :  { %v413_v6 = vpop.permute.xlu0 %412 }
 0x351   :  { %v415_v7 = vadd.f32 %v413_v6, %v401_v56 }
 0x353   :  { %582 = vtanh.f32 %v415_v7 }
 0x35d   :  { %v583_v8 = vpop.eup %582 }
 0x35e   :  { %v429_v9 = vmul.f32 %v583_v8, %v583_v8  ;;  %v438_v10 = vsel %vm425_vm2, %v583_v8, %v401_v56 }
 0x360   :  { %v430_v11 = vsub.f32 1.0, %v429_v9 }
 0x362   :  { %v431_v12 = vadd.f32 1e-06, %v430_v11 }
 0x364   :  { %584 = vlog2.f32 %v431_v12 }
 0x36e   :  { %v585_v13 = vpop.eup %584 }
 0x36f   :  { %v433_v14 = vmul.f32 0.6931472, %v585_v13 }
 0x371   :  { %v434_v15 = vsel %vm425_vm2, %v433_v14, 0.0 }
 0x372   :  { %435 = vadd.xlane.f32.xlu0 %v434_v15 }
 0x3d4   :  { %v428_v16 = vpop.xlane.xlu1 %427 }
 0x3ff   :  { %v436_v17 = vpop.xlane.xlu0 %435 }
 0x400   :  { %v437_v18 = vsub.f32 %v428_v16, %v436_v17 }
 0x402   :  { %v440_v19 = vsel %vm439_vm3, %v438_v10, %v437_v18 }
 0x403   :  { %442 = vst.msk [vmem:[#allocation8] sm:$0xff] %vm441_vm4, %v440_v19 }
 0x404   :  { %663 = shalt.err (!%p660_p0)
}
 0x405   :  { %s664_s20 = scalar_lea.hbm %s819_s6, 128 }
 0x406   :  { %p665_p1 = scmp.ne.s32.totalorder %s819_s6, %s664_s20  ;;  %p668_p2 = scmp.lt.u32.totalorder %s664_s20, %s819_s6 }
 0x408   :  { %p670_p3 = pnand %p668_p2, %p665_p1 }
 0x40a   :  { %673 = shalt.err (!%p670_p3)
}
 0x40b   :  { %452 = dma.vmem_to_hbm [thread:$0]  %s450_s16, 128, %s819_s6, [#allocation4]  }
 0x40c   :  { %678 = dma.done.wait [#allocation4], 128  }
 0x40d   :  { %679 = vsyncadd [#allocation4], 4294967168 }
 0x40e   :  { %456 = vsyncpa [#allocation3], 1 }
 0x40f   :  { %457 = vsyncpa [#allocation6], 1 }
 0x410   :  { %458 = vsyncpa [#allocation4], 1 }

</bundles_post_ra>
